<compile_context>
chip_gen: v5e
topology: v5e:2x2
jax: 0.10.0
libtpu: 0.0.40
codegen_flags: <defaults>
</compile_context>

<pallas_src>
import jax
import jax.numpy as jnp
from jax.experimental import pallas as pl
from jax.experimental.pallas import tpu as pltpu

_LANE = 128
_SUBLANE = 8


def _round_up(a, b):
    return ((a + b - 1) // b) * b


def _cdiv(a, b):
    return (a + b - 1) // b


def _patch_embed_kernel(x_ref, w_ref, b_ref, o_ref):
    # bf16 x bf16 -> f32 on the MXU, bias add on the VPU in f32, store in out dtype.
    acc = jnp.dot(x_ref[...], w_ref[...], preferred_element_type=jnp.float32)
    o_ref[...] = (acc + b_ref[...]).astype(o_ref.dtype)


def _vmem_budgets():
    """Chip-aware VMEM budgets.

    ~60% of physical VMEM for the pipeline buffers and ~70% as the Mosaic
    scoped-VMEM limit: v5e/v6e (128 MiB physical) -> ~77 / ~90 MiB,
    v7x (64 MiB physical) -> ~38 / ~45 MiB. Falls back to v7x-safe numbers
    if the query is unavailable."""
    try:
        cap = int(pltpu.get_tpu_info().vmem_capacity_bytes)
    except Exception:
        cap = 64 * 1024 * 1024
    tile_budget = min(int(cap * 0.60), 96 * 1024 * 1024)
    vmem_limit = min(int(cap * 0.70), 112 * 1024 * 1024)
    return tile_budget, vmem_limit


def _choose_tm(M, Kp, Ep, out_bytes, tile_budget):
    """Largest M tile whose working set fits the VMEM budget.

    weight/bias have constant index_maps (resident), but we conservatively account
    for two pipeline buffers each rather than relying on single-buffering support."""
    fixed = 2 * (Kp * Ep * 2 + Ep * 4)            # weight (bf16) + bias (f32)
    tm = _SUBLANE
    for cand in (1024, 512, 256, 128, 64, 32, 16, 8):
        per_tile = 2 * cand * (Kp * 2 + Ep * out_bytes)   # x tile (bf16) + out tile
        if fixed + per_tile <= tile_budget:
            tm = cand
            break
    # Keep >= ~4 M-tiles so v7x's two TensorCores both get work (harmless on the
    # single-TC v5e/v6e); never below the 8-row sublane granule.
    tm = min(tm, max(_SUBLANE, _round_up(_cdiv(M, 4), _SUBLANE)))
    return tm


def patch_embed_forward(x, weight, bias, patch_size, tokens_out=False):
    """x: (B, C, H, W), weight: (E, C, p, p), bias: (E,).

    Returns (B, E, H/p, W/p) (PyTorch Conv2d parity), or (B, H/p*W/p, E) tokens
    when tokens_out=True (skips the final NCHW transpose)."""
    B, C, H, W = x.shape
    E = weight.shape[0]
    p = patch_size
    assert H % p == 0 and W % p == 0, "img_size must be divisible by patch_size"
    Hp, Wp = H // p, W // p
    M = B * Hp * Wp
    K = C * p * p
    out_dtype = x.dtype
    out_bytes = jnp.dtype(out_dtype).itemsize

    # --- layout glue (XLA side): cast to bf16 FIRST so the patch-extraction
    # transpose moves half the bytes, then build the (M, K) patch matrix.
    # (B, C, Hp, p, Wp, p) -> (B, Hp, Wp, C, p, p) -> (M, K)
    xb = x.astype(jnp.bfloat16)
    xp = xb.reshape(B, C, Hp, p, Wp, p).transpose(0, 2, 4, 1, 3, 5).reshape(M, K)
    wk = weight.astype(jnp.bfloat16).reshape(E, K).T      # (K, E); feature order (c, ph, pw)
    bk = bias.astype(jnp.float32).reshape(1, E)

    # Lane-dense output / MXU feeds: pad E and (if needed) K up to multiples of 128.
    Ep = _round_up(E, _LANE)
    Kp = _round_up(K, _LANE)
    if Ep != E:
        wk = jnp.pad(wk, ((0, 0), (0, Ep - E)))
        bk = jnp.pad(bk, ((0, 0), (0, Ep - E)))
    if Kp != K:
        xp = jnp.pad(xp, ((0, 0), (0, Kp - K)))
        wk = jnp.pad(wk, ((0, Kp - K), (0, 0)))

    tile_budget, vmem_limit = _vmem_budgets()
    TM = _choose_tm(M, Kp, Ep, out_bytes, tile_budget)
    grid = (_cdiv(M, TM),)   # partial last block handled by Pallas' masked writeback

    cost = pl.CostEstimate(
        flops=2 * M * Kp * Ep,
        transcendentals=0,
        bytes_accessed=(M * Kp * 2) + (Kp * Ep * 2) + (Ep * 4) + (M * Ep * out_bytes),
    )

    out = pl.pallas_call(
        _patch_embed_kernel,
        out_shape=jax.ShapeDtypeStruct((M, Ep), out_dtype),
        grid_spec=pltpu.PrefetchScalarGridSpec(
            num_scalar_prefetch=0,
            grid=grid,
            in_specs=[
                pl.BlockSpec((TM, Kp), lambda i: (i, 0)),   # x-patches: tiled over M
                pl.BlockSpec((Kp, Ep), lambda i: (0, 0)),   # weight: resident
                pl.BlockSpec((1, Ep), lambda i: (0, 0)),    # bias: resident
            ],
            out_specs=pl.BlockSpec((TM, Ep), lambda i: (i, 0)),
        ),
        compiler_params=pltpu.CompilerParams(
            dimension_semantics=("parallel",),
            vmem_limit_bytes=vmem_limit,
        ),
        cost_estimate=cost,
    )(xp, wk, bk)

    # --- glue: drop lane padding; layout to match the requested output format.
    if Ep != E:
        out = out[:, :E]
    if tokens_out:
        return out.reshape(B, Hp * Wp, E)
    return out.reshape(B, Hp, Wp, E).transpose(0, 3, 1, 2)


if __name__ == "__main__":
    # Small shapes consistent with the module: B=2, in_chans=4, img_size=16,
    # patch_size=8, embed_dim=32.
    B, C, H, W = 2, 4, 16, 16
    patch_size = 8
    embed_dim = 32

    key = jax.random.PRNGKey(0)
    kx, kw, kb = jax.random.split(key, 3)

    x = jax.random.normal(kx, (B, C, H, W), dtype=jnp.float32)
    # Deterministic parameter init (synthetic; shapes match nn.Conv2d(C, E, p, p)).
    fan_in = C * patch_size * patch_size
    bound = 1.0 / (fan_in ** 0.5)
    weight = jax.random.uniform(kw, (embed_dim, C, patch_size, patch_size),
                                dtype=jnp.float32, minval=-bound, maxval=bound)
    bias = jax.random.uniform(kb, (embed_dim,), dtype=jnp.float32,
                              minval=-bound, maxval=bound)

    fwd = jax.jit(patch_embed_forward, static_argnames=("patch_size",))
    out = fwd(x, weight, bias, patch_size)
    jax.block_until_ready(out)

    # Reference: same conv semantics as nn.Conv2d, with inputs quantized to bf16 the
    # same way the kernel feeds the MXU (f32 accumulation).  NOTE: the bf16 MXU feed
    # is an intentional precision change vs a true f32 PyTorch Conv2d.
    xq = x.astype(jnp.bfloat16).astype(jnp.float32)
    wq = weight.astype(jnp.bfloat16).astype(jnp.float32)
    ref = jax.lax.conv_general_dilated(
        xq, wq, window_strides=(patch_size, patch_size), padding="VALID",
        dimension_numbers=("NCHW", "OIHW", "NCHW"),
    ) + bias.reshape(1, embed_dim, 1, 1)

    assert out.shape == (B, embed_dim, H // patch_size, W // patch_size)
    assert out.dtype == x.dtype
    assert jnp.allclose(out, ref, atol=1e-3, rtol=1e-3)

    print("KERNEL_OK")
</pallas_src>

<mosaic_0001>
module attributes {stable_mosaic.version = 11 : i64} {
  func.func @_patch_embed_kernel(%arg0: i32, %arg1: memref<8x256xbf16, #tpu.memory_space<vmem>>, %arg2: memref<256x128xbf16, #tpu.memory_space<vmem>>, %arg3: memref<1x128xf32, #tpu.memory_space<vmem>>, %arg4: memref<8x128xf32, #tpu.memory_space<vmem>>) attributes {dimension_semantics = [#tpu.dimension_semantics<parallel>], iteration_bounds = array<i64: 1>, scalar_prefetch = 0 : i64, scratch_operands = 0 : i64, tpu.core_type = #tpu.core_type<tc>, window_params = [{transform_indices = @transform_0, window_bounds = array<i64: 8, 256>}, {pipeline_mode = #tpu.pipeline_mode<synchronous>, transform_indices = @transform_1, window_bounds = array<i64: 256, 128>}, {pipeline_mode = #tpu.pipeline_mode<synchronous>, transform_indices = @transform_2, window_bounds = array<i64: 1, 128>}, {transform_indices = @transform_3, window_bounds = array<i64: 8, 128>}]} {
    %c0 = arith.constant 0 : index
    %c0_0 = arith.constant 0 : index
    %0 = vector.load %arg1[%c0, %c0_0] : memref<8x256xbf16, #tpu.memory_space<vmem>>, vector<8x256xbf16>
    %c0_1 = arith.constant 0 : index
    %c0_2 = arith.constant 0 : index
    %1 = vector.load %arg2[%c0_1, %c0_2] : memref<256x128xbf16, #tpu.memory_space<vmem>>, vector<256x128xbf16>
    %cst = arith.constant dense<0.000000e+00> : vector<8x128xf32>
    %2 = tpu.matmul %0, %1, %cst {dimension_numbers = #tpu.dot_dimension_numbers<[1], [0], [0], [1], [0, 0, 1, 1], [], []>} : vector<8x256xbf16>, vector<256x128xbf16>, vector<8x128xf32> -> vector<8x128xf32>
    %c0_3 = arith.constant 0 : index
    %c0_4 = arith.constant 0 : index
    %3 = vector.load %arg3[%c0_3, %c0_4] : memref<1x128xf32, #tpu.memory_space<vmem>>, vector<1x128xf32>
    %4 = vector.broadcast %3 : vector<1x128xf32> to vector<8x128xf32>
    %5 = arith.addf %2, %4 : vector<8x128xf32>
    %c0_5 = arith.constant 0 : index
    %c0_6 = arith.constant 0 : index
    %6 = vector.load %arg4[%c0_5, %c0_6] : memref<8x128xf32, #tpu.memory_space<vmem>>, vector<8x128xf32>
    tpu.vector_store %arg4[%c0_5, %c0_6], %5 {strides = array<i32>} : memref<8x128xf32, #tpu.memory_space<vmem>>, vector<8x128xf32>,
    return
  }
  func.func @transform_0(%arg0: i32) -> (i32, i32) {
    %c0_i32 = arith.constant 0 : i32
    %c0_i32_0 = arith.constant 0 : i32
    return %arg0, %c0_i32 : i32, i32
  }
  func.func @transform_1(%arg0: i32) -> (i32, i32) {
    %c0_i32 = arith.constant 0 : i32
    %c0_i32_0 = arith.constant 0 : i32
    %c0_i32_1 = arith.constant 0 : i32
    return %c0_i32, %c0_i32_0 : i32, i32
  }
  func.func @transform_2(%arg0: i32) -> (i32, i32) {
    %c0_i32 = arith.constant 0 : i32
    %c0_i32_0 = arith.constant 0 : i32
    %c0_i32_1 = arith.constant 0 : i32
    return %c0_i32, %c0_i32_0 : i32, i32
  }
  func.func @transform_3(%arg0: i32) -> (i32, i32) {
    %c0_i32 = arith.constant 0 : i32
    %c0_i32_0 = arith.constant 0 : i32
    return %arg0, %c0_i32 : i32, i32
  }
}

</mosaic_0001>

<bundles_post_ra>
// kernel: patch_embed_forward.1
= control target key start
LH: loop header
LB: loop body
LE: loop exit
PB: predicated region body
PF: predicated region fallthrough
CT: control target
= control target key end

     0   :  { %s384_s0 = inlined_call_operand.vmem [shape: bf16[8,256], index: 0, kind: input, shape index: {}]   ;;  %s385_s1 = inlined_call_operand.vmem [shape: bf16[256,128], index: 1, kind: input, shape index: {}]   ;;  %s386_s2 = inlined_call_operand.vmem [shape: f32[1,128], index: 2, kind: input, shape index: {}]   ;;  %s387_s3 = inlined_call_operand.hbm [shape: f32[8,128], index: 3, kind: output, shape index: {}]  }
   0x1   :  { %v269_v0 = vld [vmem:[%s385_s1 + $0x38] sm:$0xff]  ;;  %v268_v2 = vld [vmem:[%s385_s1 + $0x30] sm:$0xff]  ;;  %v267_v4 = vld [vmem:[%s385_s1 + $0x28] sm:$0xff] }
   0x2   :  { %v277_v1 = vld [vmem:[%s385_s1 + $0x78] sm:$0xff]  ;;  %155 = vmatpush.bf16.msra.mxu0 %v269_v0  ;;  %v276_v3 = vld [vmem:[%s385_s1 + $0x70] sm:$0xff]  ;;  %v275_v5 = vld [vmem:[%s385_s1 + $0x68] sm:$0xff] }
   0x3   :  { %168 = vmatpush.bf16.msra.mxu1 %v277_v1 }
   0x6   :  { %156 = vmatpush.bf16.msra.mxu0 %v268_v2 }
   0x7   :  { %169 = vmatpush.bf16.msra.mxu1 %v276_v3 }
   0x8   :  { %8 = vsyncpa [#allocation3], 0  ;;  %v266_v6 = vld [vmem:[%s385_s1 + $0x20] sm:$0xff]  ;;  %v265_v8 = vld [vmem:[%s385_s1 + $0x18] sm:$0xff]  ;;  %s306_s20 = smov [#allocation2]   ;;  %s189_s24 = sshll.u32 %s387_s3, 4  ;;  %s190_s24 = int_to_ptr.hbm [resolvable:$true] %s189_s24 }
   0x9   :  { %v274_v7 = vld [vmem:[%s385_s1 + $0x60] sm:$0xff]  ;;  %v273_v9 = vld [vmem:[%s385_s1 + $0x58] sm:$0xff]  ;;  %v264_v10 = vld [vmem:[%s385_s1 + $0x10] sm:$0xff]  ;;  %s187_s21 = sshll.u32 %s306_s20, 4  ;;  %s188_s21 = int_to_ptr.vmem [resolvable:$true] %s187_s21 }
   0xa   :  { %157 = vmatpush.bf16.msra.mxu0 %v267_v4  ;;  %v272_v11 = vld [vmem:[%s385_s1 + $0x50] sm:$0xff]  ;;  %v263_v12 = vld [vmem:[%s385_s1 + $0x8] sm:$0xff]  ;;  %v15_v14 = vld [vmem:[%s384_s0] sm:$0xff] }
   0xb   :  { %170 = vmatpush.bf16.msra.mxu1 %v275_v5  ;;  %v271_v13 = vld [vmem:[%s385_s1 + $0x48] sm:$0xff]  ;;  %v53_v15 = vunpack.c.l.b16 %v15_v14  ;;  %v54_v16 = vunpack.c.h.b16 %v15_v14  ;;  %v262_v17 = vld [vmem:[%s385_s1] sm:$0xff] }
   0xc   :  { %v270_v18 = vld [vmem:[%s385_s1 + $0x40] sm:$0xff] }
   0xd   :  { %v55_v19 = vpack.c.b16 %v53_v15, %v53_v15  ;;  %v56_v20 = vpack.c.b16 %v54_v16, %v54_v16  ;;  %v279_v21 = vld [vmem:[%s386_s2] ss:$0 sm:$0xff] }
   0xe   :  { %158 = vmatpush.bf16.msra.mxu0 %v266_v6 }
   0xf   :  { %171 = vmatpush.bf16.msra.mxu1 %v274_v7 }
  0x12   :  { %159 = vmatpush.bf16.msra.mxu0 %v265_v8 }
  0x13   :  { %172 = vmatpush.bf16.msra.mxu1 %v273_v9 }
  0x16   :  { %160 = vmatpush.bf16.msra.mxu0 %v264_v10 }
  0x17   :  { %173 = vmatpush.bf16.msra.mxu1 %v272_v11 }
  0x1a   :  { %161 = vmatpush.bf16.msra.mxu0 %v263_v12 }
  0x1b   :  { %174 = vmatpush.bf16.msra.mxu1 %v271_v13 }
  0x1e   :  { %162 = vmatpush.bf16.msra.mxu0 %v262_v17 }
  0x1f   :  { %175 = vmatpush.bf16.msra.mxu1 %v270_v18 }
  0x21   :  { %163 = vmatmul.bf16.vlgmr.msra.gmra.mxu0 %v55_v19 }
  0x22   :  { %176 = vmatmul.bf16.vlgmr.msra.gmra.mxu1 %v56_v20 }
  0x9e   :  { %v164_v22 = vpop.f32.mrf.mxu0 }
  0x9f   :  { %v177_v23 = vpop.f32.mrf.mxu1  ;;  %v165_v24 = vadd.f32 %v279_v21, %v164_v22 }
  0xa1   :  { %v178_v25 = vadd.f32 %v177_v23, %v165_v24 }
  0xa3   :  { %181 = vst [vmem:[#allocation2] sm:$0xff] %v178_v25 }
  0xa4   :  { %192 = dma.vmem_to_hbm [thread:$0]  %s188_s21, 128, %s190_s24, [#allocation3]  }
  0xa6   :  { %v166_v26 = vpop.f32.mrf.mxu0 }
  0xa7   :  { %v179_v27 = vpop.f32.mrf.mxu1 }
  0xa8   :  { %304 = dma.done.wait [#allocation3], 128  }
  0xa9   :  { %305 = vsyncadd [#allocation3], 4294967168 }
  0xaa   :  { %197 = vsyncpa [#allocation3], 1 }

</bundles_post_ra>
